<compile_context>
chip_gen: v7x
topology: tpu7x:2x2x1
jax: 0.10.0
libtpu: 0.0.40
codegen_flags: <defaults>
</compile_context>

<pallas_src>
import jax
import jax.numpy as jnp
from jax.experimental import pallas as pl
from jax.experimental.pallas import tpu as pltpu


def _dense_fma(w, b, h):
    """Dense layer in (features, batch) layout: (O, K) @ (K, TB) + (O, 1) -> (O, TB).

    Implemented as K lane-dense broadcast-FMA terms on the VPU rather than
    jnp.dot: with K, O <= 12 these matmuls would use <1% of the MXU and add
    result-FIFO latency, while the VPU path is exact f32 and fully lane-dense.
    """
    acc = w[:, 0:1] * h[0:1, :] + b
    for k in range(1, w.shape[1]):
        acc = acc + w[:, k:k + 1] * h[k:k + 1, :]
    return acc


def _mlp_kernel(x_ref,
                w_in_ref, b_in_ref,
                w_h0_ref, b_h0_ref,
                w_hd_ref, b_hd_ref,
                out_ref):
    """One batch tile. Layout is (features, batch): batch on the 128-lane axis."""
    x = x_ref[...]                                                  # (1, TB)

    h = jnp.tanh(_dense_fma(w_in_ref[...], b_in_ref[...], x))       # (12, TB)
    h = jnp.tanh(_dense_fma(w_h0_ref[...], b_h0_ref[...], h))       # (12, TB)

    # Fused head: row 0 = mu, row 1 = sigma pre-activation.
    z = _dense_fma(w_hd_ref[...], b_hd_ref[...], h)                 # (2, TB)

    # ELU (alpha=1) on the sigma row only, then + 1 + 1e-6.
    # expm1(zc) is computed as tanh(zc/2) * (exp(zc) + 1): algebraically equal
    # to expm1 and keeps its precision near 0 using only exp/tanh EUP ops.
    # Clamping to <= 0 avoids inf in the discarded branch.
    zc = jnp.minimum(z, 0.0)
    em1 = jnp.tanh(0.5 * zc) * (jnp.exp(zc) + 1.0)
    sigma = jnp.where(z > 0.0, z, em1) + (1.0 + 1e-6)

    is_mu_row = jax.lax.broadcasted_iota(jnp.int32, z.shape, 0) == 0
    out_ref[...] = jnp.where(is_mu_row, z, sigma).astype(out_ref.dtype)


def net_forward(x, params, *, tile_b=128):
    """Forward pass of `Net`. x: (B, 1) float -> (B, 2) = concat([mu, sigma], dim=1)."""
    B = x.shape[0]
    n_tiles = pl.cdiv(B, tile_b)
    b_pad = n_tiles * tile_b

    # Put the batch on the lane axis: (B, 1) -> (1, B_pad).
    x_t = x.astype(jnp.float32).reshape(1, B)
    if b_pad != B:
        x_t = jnp.pad(x_t, ((0, 0), (0, b_pad - B)))

    # Weights are kept in nn.Linear's (out, in) layout; biases as (out, 1) columns.
    w_in = params["w_in"]
    b_in = params["b_in"].reshape(-1, 1)
    w_h0 = params["w_h0"]
    b_h0 = params["b_h0"].reshape(-1, 1)
    # Fuse the mu and sigma heads into one (2, 12) matrix + (2, 1) bias.
    w_hd = jnp.concatenate([params["w_mu"], params["w_sg"]], axis=0)
    b_hd = jnp.concatenate([params["b_mu"], params["b_sg"]], axis=0).reshape(2, 1)

    const = lambda i: (0, 0)  # weights/biases stay VMEM-resident across the grid
    out_t = pl.pallas_call(
        _mlp_kernel,
        out_shape=jax.ShapeDtypeStruct((2, b_pad), jnp.float32),
        grid=(n_tiles,),
        in_specs=[
            pl.BlockSpec((1, tile_b), lambda i: (0, i)),   # x tile, streamed
            pl.BlockSpec(w_in.shape, const),
            pl.BlockSpec(b_in.shape, const),
            pl.BlockSpec(w_h0.shape, const),
            pl.BlockSpec(b_h0.shape, const),
            pl.BlockSpec(w_hd.shape, const),
            pl.BlockSpec(b_hd.shape, const),
        ],
        out_specs=pl.BlockSpec((2, tile_b), lambda i: (0, i)),  # lane-dense output
        compiler_params=pltpu.CompilerParams(
            dimension_semantics=("parallel",),
        ),
    )(x_t, w_in, b_in, w_h0, b_h0, w_hd, b_hd)

    # (2, B) -> (B, 2); column 0 = mu, column 1 = sigma (matches torch.cat dim=1).
    return out_t[:, :B].T


def init_params(key, n_feature=1, n_hidden=(12, 12), n_output=1):
    """Deterministic synthetic parameters, PyTorch nn.Linear layout/init."""
    ks = jax.random.split(key, 8)

    def linear(kw, kb, fan_in, fan_out):
        bound = 1.0 / (fan_in ** 0.5)
        w = jax.random.uniform(kw, (fan_out, fan_in), jnp.float32, -bound, bound)
        b = jax.random.uniform(kb, (fan_out,), jnp.float32, -bound, bound)
        return w, b

    w_in, b_in = linear(ks[0], ks[1], n_feature, n_hidden[0])
    w_h0, b_h0 = linear(ks[2], ks[3], n_hidden[0], n_hidden[1])
    w_mu, b_mu = linear(ks[4], ks[5], n_hidden[1], n_output)
    w_sg, b_sg = linear(ks[6], ks[7], n_hidden[1], n_output)
    return {
        "w_in": w_in, "b_in": b_in,
        "w_h0": w_h0, "b_h0": b_h0,
        "w_mu": w_mu, "b_mu": b_mu,
        "w_sg": w_sg, "b_sg": b_sg,
    }


def _reference_forward(x, p):
    """Pure-JAX reference (f32-accurate matmuls) for sanity checking."""
    hi = jax.lax.Precision.HIGHEST
    h = jnp.tanh(jnp.dot(x, p["w_in"].T, precision=hi) + p["b_in"])
    h = jnp.tanh(jnp.dot(h, p["w_h0"].T, precision=hi) + p["b_h0"])
    mu = jnp.dot(h, p["w_mu"].T, precision=hi) + p["b_mu"]
    z = jnp.dot(h, p["w_sg"].T, precision=hi) + p["b_sg"]
    sigma = jnp.where(z > 0, z, jnp.expm1(z)) + 1.0 + 1e-6
    return jnp.concatenate([mu, sigma], axis=1)


if __name__ == "__main__":
    key = jax.random.PRNGKey(0)
    k_params, k_x = jax.random.split(key)
    params = init_params(k_params)

    # (a) the spec's data shape: 100 scalar inputs like np.linspace(1, 2000, 100)
    x_small = jnp.linspace(1.0, 2000.0, 100, dtype=jnp.float32).reshape(100, 1)
    # (b) a batch that exercises multiple grid tiles + padding (300 -> 3 tiles of 128)
    x_multi = jax.random.uniform(k_x, (300, 1), jnp.float32, 1.0, 2000.0)

    for x in (x_small, x_multi):
        out = jax.block_until_ready(net_forward(x, params, tile_b=128))
        ref = _reference_forward(x, params)
        assert out.shape == (x.shape[0], 2)
        assert jnp.allclose(out, ref, atol=1e-4, rtol=1e-4), "mismatch vs reference"

    print("KERNEL_OK")
</pallas_src>

<mosaic_0001>
module attributes {stable_mosaic.version = 11 : i64} {
  func.func @_mlp_kernel(%arg0: i32, %arg1: memref<1x128xf32, #tpu.memory_space<vmem>>, %arg2: memref<12x1xf32, #tpu.memory_space<vmem>>, %arg3: memref<12x1xf32, #tpu.memory_space<vmem>>, %arg4: memref<12x12xf32, #tpu.memory_space<vmem>>, %arg5: memref<12x1xf32, #tpu.memory_space<vmem>>, %arg6: memref<2x12xf32, #tpu.memory_space<vmem>>, %arg7: memref<2x1xf32, #tpu.memory_space<vmem>>, %arg8: memref<2x128xf32, #tpu.memory_space<vmem>>) attributes {dimension_semantics = [#tpu.dimension_semantics<parallel>], iteration_bounds = array<i64: 1>, scalar_prefetch = 0 : i64, scratch_operands = 0 : i64, tpu.core_type = #tpu.core_type<tc>, window_params = [{transform_indices = @transform_0, window_bounds = array<i64: 1, 128>}, {pipeline_mode = #tpu.pipeline_mode<synchronous>, transform_indices = @transform_1, window_bounds = array<i64: 12, 1>}, {pipeline_mode = #tpu.pipeline_mode<synchronous>, transform_indices = @transform_2, window_bounds = array<i64: 12, 1>}, {pipeline_mode = #tpu.pipeline_mode<synchronous>, transform_indices = @transform_3, window_bounds = array<i64: 12, 12>}, {pipeline_mode = #tpu.pipeline_mode<synchronous>, transform_indices = @transform_4, window_bounds = array<i64: 12, 1>}, {pipeline_mode = #tpu.pipeline_mode<synchronous>, transform_indices = @transform_5, window_bounds = array<i64: 2, 12>}, {pipeline_mode = #tpu.pipeline_mode<synchronous>, transform_indices = @transform_6, window_bounds = array<i64: 2, 1>}, {transform_indices = @transform_7, window_bounds = array<i64: 2, 128>}]} {
    %c0 = arith.constant 0 : index
    %c0_0 = arith.constant 0 : index
    %0 = vector.load %arg1[%c0, %c0_0] : memref<1x128xf32, #tpu.memory_space<vmem>>, vector<1x128xf32>
    %c0_1 = arith.constant 0 : index
    %c0_2 = arith.constant 0 : index
    %1 = vector.load %arg2[%c0_1, %c0_2] : memref<12x1xf32, #tpu.memory_space<vmem>>, vector<12x1xf32>
    %c0_3 = arith.constant 0 : index
    %c0_4 = arith.constant 0 : index
    %2 = vector.load %arg3[%c0_3, %c0_4] : memref<12x1xf32, #tpu.memory_space<vmem>>, vector<12x1xf32>
    %3 = vector.broadcast %1 : vector<12x1xf32> to vector<12x128xf32>
    %4 = vector.broadcast %0 : vector<1x128xf32> to vector<12x128xf32>
    %5 = arith.mulf %3, %4 : vector<12x128xf32>
    %6 = vector.broadcast %2 : vector<12x1xf32> to vector<12x128xf32>
    %7 = arith.addf %5, %6 : vector<12x128xf32>
    %8 = math.tanh %7 : vector<12x128xf32>
    %c0_5 = arith.constant 0 : index
    %c0_6 = arith.constant 0 : index
    %9 = vector.load %arg4[%c0_5, %c0_6] : memref<12x12xf32, #tpu.memory_space<vmem>>, vector<12x12xf32>
    %c0_7 = arith.constant 0 : index
    %c0_8 = arith.constant 0 : index
    %10 = vector.load %arg5[%c0_7, %c0_8] : memref<12x1xf32, #tpu.memory_space<vmem>>, vector<12x1xf32>
    %11 = vector.extract_strided_slice %9 {offsets = [0, 0], sizes = [12, 1], strides = [1, 1]} : vector<12x12xf32> to vector<12x1xf32>
    %12 = vector.extract_strided_slice %8 {offsets = [0, 0], sizes = [1, 128], strides = [1, 1]} : vector<12x128xf32> to vector<1x128xf32>
    %13 = vector.broadcast %11 : vector<12x1xf32> to vector<12x128xf32>
    %14 = vector.broadcast %12 : vector<1x128xf32> to vector<12x128xf32>
    %15 = arith.mulf %13, %14 : vector<12x128xf32>
    %16 = vector.broadcast %10 : vector<12x1xf32> to vector<12x128xf32>
    %17 = arith.addf %15, %16 : vector<12x128xf32>
    %18 = vector.extract_strided_slice %9 {offsets = [0, 1], sizes = [12, 1], strides = [1, 1]} : vector<12x12xf32> to vector<12x1xf32>
    %19 = vector.extract_strided_slice %8 {offsets = [1, 0], sizes = [1, 128], strides = [1, 1]} : vector<12x128xf32> to vector<1x128xf32>
    %20 = vector.broadcast %18 : vector<12x1xf32> to vector<12x128xf32>
    %21 = vector.broadcast %19 : vector<1x128xf32> to vector<12x128xf32>
    %22 = arith.mulf %20, %21 : vector<12x128xf32>
    %23 = arith.addf %17, %22 : vector<12x128xf32>
    %24 = vector.extract_strided_slice %9 {offsets = [0, 2], sizes = [12, 1], strides = [1, 1]} : vector<12x12xf32> to vector<12x1xf32>
    %25 = vector.extract_strided_slice %8 {offsets = [2, 0], sizes = [1, 128], strides = [1, 1]} : vector<12x128xf32> to vector<1x128xf32>
    %26 = vector.broadcast %24 : vector<12x1xf32> to vector<12x128xf32>
    %27 = vector.broadcast %25 : vector<1x128xf32> to vector<12x128xf32>
    %28 = arith.mulf %26, %27 : vector<12x128xf32>
    %29 = arith.addf %23, %28 : vector<12x128xf32>
    %30 = vector.extract_strided_slice %9 {offsets = [0, 3], sizes = [12, 1], strides = [1, 1]} : vector<12x12xf32> to vector<12x1xf32>
    %31 = vector.extract_strided_slice %8 {offsets = [3, 0], sizes = [1, 128], strides = [1, 1]} : vector<12x128xf32> to vector<1x128xf32>
    %32 = vector.broadcast %30 : vector<12x1xf32> to vector<12x128xf32>
    %33 = vector.broadcast %31 : vector<1x128xf32> to vector<12x128xf32>
    %34 = arith.mulf %32, %33 : vector<12x128xf32>
    %35 = arith.addf %29, %34 : vector<12x128xf32>
    %36 = vector.extract_strided_slice %9 {offsets = [0, 4], sizes = [12, 1], strides = [1, 1]} : vector<12x12xf32> to vector<12x1xf32>
    %37 = vector.extract_strided_slice %8 {offsets = [4, 0], sizes = [1, 128], strides = [1, 1]} : vector<12x128xf32> to vector<1x128xf32>
    %38 = vector.broadcast %36 : vector<12x1xf32> to vector<12x128xf32>
    %39 = vector.broadcast %37 : vector<1x128xf32> to vector<12x128xf32>
    %40 = arith.mulf %38, %39 : vector<12x128xf32>
    %41 = arith.addf %35, %40 : vector<12x128xf32>
    %42 = vector.extract_strided_slice %9 {offsets = [0, 5], sizes = [12, 1], strides = [1, 1]} : vector<12x12xf32> to vector<12x1xf32>
    %43 = vector.extract_strided_slice %8 {offsets = [5, 0], sizes = [1, 128], strides = [1, 1]} : vector<12x128xf32> to vector<1x128xf32>
    %44 = vector.broadcast %42 : vector<12x1xf32> to vector<12x128xf32>
    %45 = vector.broadcast %43 : vector<1x128xf32> to vector<12x128xf32>
    %46 = arith.mulf %44, %45 : vector<12x128xf32>
    %47 = arith.addf %41, %46 : vector<12x128xf32>
    %48 = vector.extract_strided_slice %9 {offsets = [0, 6], sizes = [12, 1], strides = [1, 1]} : vector<12x12xf32> to vector<12x1xf32>
    %49 = vector.extract_strided_slice %8 {offsets = [6, 0], sizes = [1, 128], strides = [1, 1]} : vector<12x128xf32> to vector<1x128xf32>
    %50 = vector.broadcast %48 : vector<12x1xf32> to vector<12x128xf32>
    %51 = vector.broadcast %49 : vector<1x128xf32> to vector<12x128xf32>
    %52 = arith.mulf %50, %51 : vector<12x128xf32>
    %53 = arith.addf %47, %52 : vector<12x128xf32>
    %54 = vector.extract_strided_slice %9 {offsets = [0, 7], sizes = [12, 1], strides = [1, 1]} : vector<12x12xf32> to vector<12x1xf32>
    %55 = vector.extract_strided_slice %8 {offsets = [7, 0], sizes = [1, 128], strides = [1, 1]} : vector<12x128xf32> to vector<1x128xf32>
    %56 = vector.broadcast %54 : vector<12x1xf32> to vector<12x128xf32>
    %57 = vector.broadcast %55 : vector<1x128xf32> to vector<12x128xf32>
    %58 = arith.mulf %56, %57 : vector<12x128xf32>
    %59 = arith.addf %53, %58 : vector<12x128xf32>
    %60 = vector.extract_strided_slice %9 {offsets = [0, 8], sizes = [12, 1], strides = [1, 1]} : vector<12x12xf32> to vector<12x1xf32>
    %61 = vector.extract_strided_slice %8 {offsets = [8, 0], sizes = [1, 128], strides = [1, 1]} : vector<12x128xf32> to vector<1x128xf32>
    %62 = vector.broadcast %60 : vector<12x1xf32> to vector<12x128xf32>
    %63 = vector.broadcast %61 : vector<1x128xf32> to vector<12x128xf32>
    %64 = arith.mulf %62, %63 : vector<12x128xf32>
    %65 = arith.addf %59, %64 : vector<12x128xf32>
    %66 = vector.extract_strided_slice %9 {offsets = [0, 9], sizes = [12, 1], strides = [1, 1]} : vector<12x12xf32> to vector<12x1xf32>
    %67 = vector.extract_strided_slice %8 {offsets = [9, 0], sizes = [1, 128], strides = [1, 1]} : vector<12x128xf32> to vector<1x128xf32>
    %68 = vector.broadcast %66 : vector<12x1xf32> to vector<12x128xf32>
    %69 = vector.broadcast %67 : vector<1x128xf32> to vector<12x128xf32>
    %70 = arith.mulf %68, %69 : vector<12x128xf32>
    %71 = arith.addf %65, %70 : vector<12x128xf32>
    %72 = vector.extract_strided_slice %9 {offsets = [0, 10], sizes = [12, 1], strides = [1, 1]} : vector<12x12xf32> to vector<12x1xf32>
    %73 = vector.extract_strided_slice %8 {offsets = [10, 0], sizes = [1, 128], strides = [1, 1]} : vector<12x128xf32> to vector<1x128xf32>
    %74 = vector.broadcast %72 : vector<12x1xf32> to vector<12x128xf32>
    %75 = vector.broadcast %73 : vector<1x128xf32> to vector<12x128xf32>
    %76 = arith.mulf %74, %75 : vector<12x128xf32>
    %77 = arith.addf %71, %76 : vector<12x128xf32>
    %78 = vector.extract_strided_slice %9 {offsets = [0, 11], sizes = [12, 1], strides = [1, 1]} : vector<12x12xf32> to vector<12x1xf32>
    %79 = vector.extract_strided_slice %8 {offsets = [11, 0], sizes = [1, 128], strides = [1, 1]} : vector<12x128xf32> to vector<1x128xf32>
    %80 = vector.broadcast %78 : vector<12x1xf32> to vector<12x128xf32>
    %81 = vector.broadcast %79 : vector<1x128xf32> to vector<12x128xf32>
    %82 = arith.mulf %80, %81 : vector<12x128xf32>
    %83 = arith.addf %77, %82 : vector<12x128xf32>
    %84 = math.tanh %83 : vector<12x128xf32>
    %c0_9 = arith.constant 0 : index
    %c0_10 = arith.constant 0 : index
    %85 = vector.load %arg6[%c0_9, %c0_10] : memref<2x12xf32, #tpu.memory_space<vmem>>, vector<2x12xf32>
    %c0_11 = arith.constant 0 : index
    %c0_12 = arith.constant 0 : index
    %86 = vector.load %arg7[%c0_11, %c0_12] : memref<2x1xf32, #tpu.memory_space<vmem>>, vector<2x1xf32>
    %87 = vector.extract_strided_slice %85 {offsets = [0, 0], sizes = [2, 1], strides = [1, 1]} : vector<2x12xf32> to vector<2x1xf32>
    %88 = vector.extract_strided_slice %84 {offsets = [0, 0], sizes = [1, 128], strides = [1, 1]} : vector<12x128xf32> to vector<1x128xf32>
    %89 = vector.broadcast %87 : vector<2x1xf32> to vector<2x128xf32>
    %90 = vector.broadcast %88 : vector<1x128xf32> to vector<2x128xf32>
    %91 = arith.mulf %89, %90 : vector<2x128xf32>
    %92 = vector.broadcast %86 : vector<2x1xf32> to vector<2x128xf32>
    %93 = arith.addf %91, %92 : vector<2x128xf32>
    %94 = vector.extract_strided_slice %85 {offsets = [0, 1], sizes = [2, 1], strides = [1, 1]} : vector<2x12xf32> to vector<2x1xf32>
    %95 = vector.extract_strided_slice %84 {offsets = [1, 0], sizes = [1, 128], strides = [1, 1]} : vector<12x128xf32> to vector<1x128xf32>
    %96 = vector.broadcast %94 : vector<2x1xf32> to vector<2x128xf32>
    %97 = vector.broadcast %95 : vector<1x128xf32> to vector<2x128xf32>
    %98 = arith.mulf %96, %97 : vector<2x128xf32>
    %99 = arith.addf %93, %98 : vector<2x128xf32>
    %100 = vector.extract_strided_slice %85 {offsets = [0, 2], sizes = [2, 1], strides = [1, 1]} : vector<2x12xf32> to vector<2x1xf32>
    %101 = vector.extract_strided_slice %84 {offsets = [2, 0], sizes = [1, 128], strides = [1, 1]} : vector<12x128xf32> to vector<1x128xf32>
    %102 = vector.broadcast %100 : vector<2x1xf32> to vector<2x128xf32>
    %103 = vector.broadcast %101 : vector<1x128xf32> to vector<2x128xf32>
    %104 = arith.mulf %102, %103 : vector<2x128xf32>
    %105 = arith.addf %99, %104 : vector<2x128xf32>
    %106 = vector.extract_strided_slice %85 {offsets = [0, 3], sizes = [2, 1], strides = [1, 1]} : vector<2x12xf32> to vector<2x1xf32>
    %107 = vector.extract_strided_slice %84 {offsets = [3, 0], sizes = [1, 128], strides = [1, 1]} : vector<12x128xf32> to vector<1x128xf32>
    %108 = vector.broadcast %106 : vector<2x1xf32> to vector<2x128xf32>
    %109 = vector.broadcast %107 : vector<1x128xf32> to vector<2x128xf32>
    %110 = arith.mulf %108, %109 : vector<2x128xf32>
    %111 = arith.addf %105, %110 : vector<2x128xf32>
    %112 = vector.extract_strided_slice %85 {offsets = [0, 4], sizes = [2, 1], strides = [1, 1]} : vector<2x12xf32> to vector<2x1xf32>
    %113 = vector.extract_strided_slice %84 {offsets = [4, 0], sizes = [1, 128], strides = [1, 1]} : vector<12x128xf32> to vector<1x128xf32>
    %114 = vector.broadcast %112 : vector<2x1xf32> to vector<2x128xf32>
    %115 = vector.broadcast %113 : vector<1x128xf32> to vector<2x128xf32>
    %116 = arith.mulf %114, %115 : vector<2x128xf32>
    %117 = arith.addf %111, %116 : vector<2x128xf32>
    %118 = vector.extract_strided_slice %85 {offsets = [0, 5], sizes = [2, 1], strides = [1, 1]} : vector<2x12xf32> to vector<2x1xf32>
    %119 = vector.extract_strided_slice %84 {offsets = [5, 0], sizes = [1, 128], strides = [1, 1]} : vector<12x128xf32> to vector<1x128xf32>
    %120 = vector.broadcast %118 : vector<2x1xf32> to vector<2x128xf32>
    %121 = vector.broadcast %119 : vector<1x128xf32> to vector<2x128xf32>
    %122 = arith.mulf %120, %121 : vector<2x128xf32>
    %123 = arith.addf %117, %122 : vector<2x128xf32>
    %124 = vector.extract_strided_slice %85 {offsets = [0, 6], sizes = [2, 1], strides = [1, 1]} : vector<2x12xf32> to vector<2x1xf32>
    %125 = vector.extract_strided_slice %84 {offsets = [6, 0], sizes = [1, 128], strides = [1, 1]} : vector<12x128xf32> to vector<1x128xf32>
    %126 = vector.broadcast %124 : vector<2x1xf32> to vector<2x128xf32>
    %127 = vector.broadcast %125 : vector<1x128xf32> to vector<2x128xf32>
    %128 = arith.mulf %126, %127 : vector<2x128xf32>
    %129 = arith.addf %123, %128 : vector<2x128xf32>
    %130 = vector.extract_strided_slice %85 {offsets = [0, 7], sizes = [2, 1], strides = [1, 1]} : vector<2x12xf32> to vector<2x1xf32>
    %131 = vector.extract_strided_slice %84 {offsets = [7, 0], sizes = [1, 128], strides = [1, 1]} : vector<12x128xf32> to vector<1x128xf32>
    %132 = vector.broadcast %130 : vector<2x1xf32> to vector<2x128xf32>
    %133 = vector.broadcast %131 : vector<1x128xf32> to vector<2x128xf32>
    %134 = arith.mulf %132, %133 : vector<2x128xf32>
    %135 = arith.addf %129, %134 : vector<2x128xf32>
    %136 = vector.extract_strided_slice %85 {offsets = [0, 8], sizes = [2, 1], strides = [1, 1]} : vector<2x12xf32> to vector<2x1xf32>
    %137 = vector.extract_strided_slice %84 {offsets = [8, 0], sizes = [1, 128], strides = [1, 1]} : vector<12x128xf32> to vector<1x128xf32>
    %138 = vector.broadcast %136 : vector<2x1xf32> to vector<2x128xf32>
    %139 = vector.broadcast %137 : vector<1x128xf32> to vector<2x128xf32>
    %140 = arith.mulf %138, %139 : vector<2x128xf32>
    %141 = arith.addf %135, %140 : vector<2x128xf32>
    %142 = vector.extract_strided_slice %85 {offsets = [0, 9], sizes = [2, 1], strides = [1, 1]} : vector<2x12xf32> to vector<2x1xf32>
    %143 = vector.extract_strided_slice %84 {offsets = [9, 0], sizes = [1, 128], strides = [1, 1]} : vector<12x128xf32> to vector<1x128xf32>
    %144 = vector.broadcast %142 : vector<2x1xf32> to vector<2x128xf32>
    %145 = vector.broadcast %143 : vector<1x128xf32> to vector<2x128xf32>
    %146 = arith.mulf %144, %145 : vector<2x128xf32>
    %147 = arith.addf %141, %146 : vector<2x128xf32>
    %148 = vector.extract_strided_slice %85 {offsets = [0, 10], sizes = [2, 1], strides = [1, 1]} : vector<2x12xf32> to vector<2x1xf32>
    %149 = vector.extract_strided_slice %84 {offsets = [10, 0], sizes = [1, 128], strides = [1, 1]} : vector<12x128xf32> to vector<1x128xf32>
    %150 = vector.broadcast %148 : vector<2x1xf32> to vector<2x128xf32>
    %151 = vector.broadcast %149 : vector<1x128xf32> to vector<2x128xf32>
    %152 = arith.mulf %150, %151 : vector<2x128xf32>
    %153 = arith.addf %147, %152 : vector<2x128xf32>
    %154 = vector.extract_strided_slice %85 {offsets = [0, 11], sizes = [2, 1], strides = [1, 1]} : vector<2x12xf32> to vector<2x1xf32>
    %155 = vector.extract_strided_slice %84 {offsets = [11, 0], sizes = [1, 128], strides = [1, 1]} : vector<12x128xf32> to vector<1x128xf32>
    %156 = vector.broadcast %154 : vector<2x1xf32> to vector<2x128xf32>
    %157 = vector.broadcast %155 : vector<1x128xf32> to vector<2x128xf32>
    %158 = arith.mulf %156, %157 : vector<2x128xf32>
    %159 = arith.addf %153, %158 : vector<2x128xf32>
    %cst = arith.constant 0.000000e+00 : f32
    %160 = vector.broadcast %cst : f32 to vector<2x128xf32>
    %161 = arith.minimumf %159, %160 : vector<2x128xf32>
    %cst_13 = arith.constant 5.000000e-01 : f32
    %162 = vector.broadcast %cst_13 : f32 to vector<2x128xf32>
    %163 = arith.mulf %162, %161 : vector<2x128xf32>
    %164 = math.tanh %163 : vector<2x128xf32>
    %165 = math.exp %161 : vector<2x128xf32>
    %cst_14 = arith.constant 1.000000e+00 : f32
    %166 = vector.broadcast %cst_14 : f32 to vector<2x128xf32>
    %167 = arith.addf %165, %166 : vector<2x128xf32>
    %168 = arith.mulf %164, %167 : vector<2x128xf32>
    %cst_15 = arith.constant 0.000000e+00 : f32
    %169 = vector.broadcast %cst_15 : f32 to vector<2x128xf32>
    %170 = arith.cmpf ogt, %159, %169 : vector<2x128xf32>
    %171 = arith.select %170, %159, %168 : vector<2x128xi1>, vector<2x128xf32>
    %cst_16 = arith.constant 1.00000095 : f32
    %172 = vector.broadcast %cst_16 : f32 to vector<2x128xf32>
    %173 = arith.addf %171, %172 : vector<2x128xf32>
    %174 = tpu.iota {dimensions = array<i32: 0>} : vector<2x128xi32>
    %c0_i32 = arith.constant 0 : i32
    %175 = vector.broadcast %c0_i32 : i32 to vector<2x128xi32>
    %176 = arith.cmpi eq, %174, %175 : vector<2x128xi32>
    %177 = arith.select %176, %159, %173 : vector<2x128xi1>, vector<2x128xf32>
    %c0_17 = arith.constant 0 : index
    %c0_18 = arith.constant 0 : index
    %178 = vector.load %arg8[%c0_17, %c0_18] : memref<2x128xf32, #tpu.memory_space<vmem>>, vector<2x128xf32>
    tpu.vector_store %arg8[%c0_17, %c0_18], %177 {strides = array<i32>} : memref<2x128xf32, #tpu.memory_space<vmem>>, vector<2x128xf32>,
    return
  }
  func.func @transform_0(%arg0: i32) -> (i32, i32) {
    %c0_i32 = arith.constant 0 : i32
    %c0_i32_0 = arith.constant 0 : i32
    return %c0_i32, %arg0 : i32, i32
  }
  func.func @transform_1(%arg0: i32) -> (i32, i32) {
    %c0_i32 = arith.constant 0 : i32
    %c0_i32_0 = arith.constant 0 : i32
    %c0_i32_1 = arith.constant 0 : i32
    return %c0_i32, %c0_i32_0 : i32, i32
  }
  func.func @transform_2(%arg0: i32) -> (i32, i32) {
    %c0_i32 = arith.constant 0 : i32
    %c0_i32_0 = arith.constant 0 : i32
    %c0_i32_1 = arith.constant 0 : i32
    return %c0_i32, %c0_i32_0 : i32, i32
  }
  func.func @transform_3(%arg0: i32) -> (i32, i32) {
    %c0_i32 = arith.constant 0 : i32
    %c0_i32_0 = arith.constant 0 : i32
    %c0_i32_1 = arith.constant 0 : i32
    return %c0_i32, %c0_i32_0 : i32, i32
  }
  func.func @transform_4(%arg0: i32) -> (i32, i32) {
    %c0_i32 = arith.constant 0 : i32
    %c0_i32_0 = arith.constant 0 : i32
    %c0_i32_1 = arith.constant 0 : i32
    return %c0_i32, %c0_i32_0 : i32, i32
  }
  func.func @transform_5(%arg0: i32) -> (i32, i32) {
    %c0_i32 = arith.constant 0 : i32
    %c0_i32_0 = arith.constant 0 : i32
    %c0_i32_1 = arith.constant 0 : i32
    return %c0_i32, %c0_i32_0 : i32, i32
  }
  func.func @transform_6(%arg0: i32) -> (i32, i32) {
    %c0_i32 = arith.constant 0 : i32
    %c0_i32_0 = arith.constant 0 : i32
    %c0_i32_1 = arith.constant 0 : i32
    return %c0_i32, %c0_i32_0 : i32, i32
  }
  func.func @transform_7(%arg0: i32) -> (i32, i32) {
    %c0_i32 = arith.constant 0 : i32
    %c0_i32_0 = arith.constant 0 : i32
    return %c0_i32, %arg0 : i32, i32
  }
}

</mosaic_0001>

<bundles_post_ra>
// kernel: tpu_custom_call.1
= control target key start
LH: loop header
LB: loop body
LE: loop exit
PB: predicated region body
PF: predicated region fallthrough
CT: control target
= control target key end

     0   :  { %v519_v2 = vmov 1   ;;  %v520_v3 = vmov 0   ;;  %s699_s0 = inlined_call_operand.vmem [shape: f32[1,128], index: 0, kind: input, shape index: {}]   ;;  %s700_s1 = inlined_call_operand.vmem [shape: f32[12,1], index: 1, kind: input, shape index: {}]   ;;  %s701_s2 = inlined_call_operand.vmem [shape: f32[12,1], index: 2, kind: input, shape index: {}]   ;;  %s702_s3 = inlined_call_operand.vmem [shape: f32[12,12], index: 3, kind: input, shape index: {}]   ;;  %s703_s4 = inlined_call_operand.vmem [shape: f32[12,1], index: 4, kind: input, shape index: {}]   ;;  %s704_s5 = inlined_call_operand.vmem [shape: f32[2,12], index: 5, kind: input, shape index: {}]   ;;  %s705_s6 = inlined_call_operand.vmem [shape: f32[2,1], index: 6, kind: input, shape index: {}]   ;;  %s706_s7 = inlined_call_operand.hbm [shape: f32[2,128], index: 7, kind: output, shape index: {}]  }
   0x1   :  { %v575_v0 = vld [vmem:[%s702_s3] sm:$0xff]  ;;  %v29_v1 = vld [vmem:[%s700_s1 + $0x8] sm:$0xf]  ;;  %446 = vset.pattern.permute.xlu0 %v519_v2  ;;  %445 = vset.pattern.permute.xlu1 %v520_v3 }
   0x2   :  { %97 = vperm.xlu0 %446, %v575_v0   ;;  %39 = vperm.xlu1 %445, %v29_v1   ;;  %v31_v4 = vld [vmem:[%s701_s2 + $0x8] sm:$0xf] }
   0x3   :  { %12 = vsyncpa [#allocation3], 0  ;;  %v521_v5 = vmov 4   ;;  %v66_v6 = vld [vmem:[%s703_s4] sm:$0xff]  ;;  %v522_v7 = vmov 7   ;;  %v523_v8 = vmov 2   ;;  %v78_v35 = vlaneseq }
   0x4   :  { %v28_v9 = vld [vmem:[%s700_s1] sm:$0xff]  ;;  %v524_v11 = vmov 3   ;;  %v525_v12 = vmov 5   ;;  %v67_v13 = vld [vmem:[%s703_s4 + $0x8] sm:$0xf]  ;;  %v526_v14 = vmov 6  }
   0x5   :  { %v30_v10 = vld [vmem:[%s701_s2] sm:$0xff]  ;;  %v65_v15 = vld [vmem:[%s702_s3 + $0x8] sm:$0xf]  ;;  %v527_v16 = vmov 11   ;;  %v528_v17 = vmov 8   ;;  %v529_v18 = vmov 9  }
   0x6   :  { %449 = vset.pattern.permute.xlu0 %v521_v5  ;;  %57 = vperm.xlu1 %445, %v31_v4   ;;  %v274_v19 = vld [vmem:[%s704_s5] sm:$0x3]  ;;  %v530_v20 = vmov 10   ;;  %v636_v37 = vshrl.u32 %v78_v35, 7 }
   0x7   :  { %145 = vperm.xlu0 %449, %v575_v0   ;;  %v275_v21 = vld [vmem:[%s705_s6] sm:$0x3] }
   0x8   :  { %v431_v29 = vld [vmem:[%s699_s0] ss:$0 sm:$0xff]  ;;  %v639_v39 = vsub.s32 0, %v636_v37  ;;  %v642_v40 = vsub.s32 1, %v636_v37  ;;  %v646_v43 = vsub.s32 2, %v636_v37  ;;  %v651_v50 = vsub.s32 3, %v636_v37 }
   0x9   :  { %v154_v52 = vsub.s32 4, %v636_v37  ;;  %v170_v59 = vsub.s32 5, %v636_v37  ;;  %s531_s0 = smov [#allocation2]   ;;  %vm414_vm1 = vcmp.eq.s32.totalorder %v636_v37, 0 }
   0xa   :  { %86 = vperm.xlu1 %445, %v66_v6   ;;  %s423_s17 = sshll.u32 %s531_s0, 4  ;;  %s424_s17 = int_to_ptr.vmem [resolvable:$true] %s423_s17 }
   0xb   :  { %452 = vset.pattern.permute.xlu0 %v522_v7  ;;  %s495_s18 = scalar_lea.vmem %s424_s17, 32  ;;  %p500_p1 = scmp.lt.s32.totalorder %s424_s17, %s424_s17 }
   0xc   :  { %193 = vperm.xlu0 %452, %v575_v0   ;;  %p496_p0 = scmp.ne.s32.totalorder %s424_s17, %s495_s18  ;;  %p501_p2 = scmp.lt.s32.totalorder %s495_s18, %s495_s18 }
   0xe   :  { %447 = vset.pattern.permute.xlu1 %v523_v8  ;;  %p502_p3 = por %p501_p2, %p500_p1 }
   0xf   :  { %113 = vperm.xlu1 %447, %v575_v0  }
  0x10   :  { %453 = vset.pattern.permute.xlu0 %v520_v3  ;;  %p503_p4 = pnand %p502_p3, %p496_p0 }
  0x11   :  { %34 = vperm.xlu0 %453, %v28_v9  }
  0x13   :  { %448 = vset.pattern.permute.xlu1 %v524_v11 }
  0x14   :  { %129 = vperm.xlu1 %448, %v575_v0  }
  0x15   :  { %52 = vperm.xlu0 %453, %v30_v10  }
  0x18   :  { %450 = vset.pattern.permute.xlu1 %v525_v12 }
  0x19   :  { %161 = vperm.xlu1 %450, %v575_v0   ;;  %70 = vperm.xlu0 %453, %v575_v0  }
  0x1d   :  { %451 = vset.pattern.permute.xlu1 %v526_v14  ;;  %91 = vperm.xlu0 %453, %v67_v13  }
  0x1e   :  { %177 = vperm.xlu1 %451, %v575_v0  }
  0x21   :  { %458 = vset.pattern.permute.xlu0 %v523_v8 }
  0x22   :  { %454 = vset.pattern.permute.xlu1 %v520_v3  ;;  %117 = vperm.xlu0 %458, %v65_v15  }
  0x23   :  { %75 = vperm.xlu1 %454, %v65_v15  }
  0x26   :  { %461 = vset.pattern.permute.xlu0 %v527_v16 }
  0x27   :  { %455 = vset.pattern.permute.xlu1 %v528_v17  ;;  %257 = vperm.xlu0 %461, %v575_v0  }
  0x28   :  { %209 = vperm.xlu1 %455, %v575_v0  }
  0x2b   :  { %464 = vset.pattern.permute.xlu0 %v526_v14 }
  0x2c   :  { %456 = vset.pattern.permute.xlu1 %v519_v2  ;;  %181 = vperm.xlu0 %464, %v65_v15  }
  0x2d   :  { %101 = vperm.xlu1 %456, %v65_v15  }
  0x30   :  { %467 = vset.pattern.permute.xlu0 %v529_v18 }
  0x31   :  { %457 = vset.pattern.permute.xlu1 %v529_v18  ;;  %229 = vperm.xlu0 %467, %v65_v15  }
  0x32   :  { %225 = vperm.xlu1 %457, %v575_v0  }
  0x35   :  { %470 = vset.pattern.permute.xlu0 %v520_v3 }
  0x36   :  { %459 = vset.pattern.permute.xlu1 %v530_v20  ;;  %278 = vperm.xlu0 %470, %v274_v19  }
  0x37   :  { %241 = vperm.xlu1 %459, %v575_v0  }
  0x3a   :  { %473 = vset.pattern.permute.xlu0 %v523_v8  ;;  %v202_v8 = vsub.s32 7, %v636_v37 }
  0x3b   :  { %460 = vset.pattern.permute.xlu1 %v524_v11  ;;  %303 = vperm.xlu0 %473, %v274_v19  }
  0x3c   :  { %133 = vperm.xlu1 %460, %v65_v15  }
  0x3f   :  { %476 = vset.pattern.permute.xlu0 %v525_v12 }
  0x40   :  { %462 = vset.pattern.permute.xlu1 %v521_v5  ;;  %333 = vperm.xlu0 %476, %v274_v19  }
  0x41   :  { %149 = vperm.xlu1 %462, %v65_v15  }
  0x44   :  { %479 = vset.pattern.permute.xlu0 %v528_v17 }
  0x45   :  { %463 = vset.pattern.permute.xlu1 %v525_v12  ;;  %363 = vperm.xlu0 %479, %v274_v19  }
  0x46   :  { %165 = vperm.xlu1 %463, %v65_v15  }
  0x49   :  { %482 = vset.pattern.permute.xlu0 %v527_v16 }
  0x4a   :  { %465 = vset.pattern.permute.xlu1 %v522_v7  ;;  %393 = vperm.xlu0 %482, %v274_v19  }
  0x4b   :  { %197 = vperm.xlu1 %465, %v65_v15  }
  0x4f   :  { %466 = vset.pattern.permute.xlu1 %v528_v17 }
  0x50   :  { %213 = vperm.xlu1 %466, %v65_v15  }
  0x54   :  { %468 = vset.pattern.permute.xlu1 %v530_v20 }
  0x55   :  { %245 = vperm.xlu1 %468, %v65_v15  }
  0x59   :  { %469 = vset.pattern.permute.xlu1 %v527_v16 }
  0x5a   :  { %261 = vperm.xlu1 %469, %v65_v15  }
  0x5e   :  { %471 = vset.pattern.permute.xlu1 %v520_v3 }
  0x5f   :  { %288 = vperm.xlu1 %471, %v275_v21  }
  0x63   :  { %472 = vset.pattern.permute.xlu1 %v519_v2  ;;  %v186_v2 = vsub.s32 6, %v636_v37 }
  0x64   :  { %293 = vperm.xlu1 %472, %v274_v19  }
  0x68   :  { %474 = vset.pattern.permute.xlu1 %v524_v11 }
  0x69   :  { %313 = vperm.xlu1 %474, %v274_v19  }
  0x6d   :  { %475 = vset.pattern.permute.xlu1 %v521_v5 }
  0x6e   :  { %323 = vperm.xlu1 %475, %v274_v19  }
  0x72   :  { %477 = vset.pattern.permute.xlu1 %v526_v14 }
  0x73   :  { %343 = vperm.xlu1 %477, %v274_v19  }
  0x77   :  { %478 = vset.pattern.permute.xlu1 %v522_v7 }
  0x78   :  { %353 = vperm.xlu1 %478, %v274_v19  }
  0x7c   :  { %480 = vset.pattern.permute.xlu1 %v529_v18 }
  0x7d   :  { %373 = vperm.xlu1 %480, %v274_v19  }
  0x81   :  { %481 = vset.pattern.permute.xlu1 %v530_v20  ;;  %v40_v22 = vpop.permute.xlu1 %39  ;;  %v98_v23 = vpop.permute.xlu0 %97 }
  0x82   :  { %383 = vperm.xlu1 %481, %v274_v19   ;;  %v49_v57 = vmul.f32 %v431_v29, %v40_v22 }
  0x85   :  { %v58_v24 = vpop.permute.xlu1 %57 }
  0x86   :  { %v146_v25 = vpop.permute.xlu0 %145  ;;  %v61_v62 = vadd.f32 %v58_v24, %v49_v57 }
  0x89   :  { %v87_v26 = vpop.permute.xlu1 %86 }
  0x8b   :  { %v194_v27 = vpop.permute.xlu0 %193 }
  0x8e   :  { %v114_v28 = vpop.permute.xlu1 %113 }
  0x90   :  { %v35_v30 = vpop.permute.xlu0 %34 }
  0x91   :  { %v48_v31 = vmul.f32 %v431_v29, %v35_v30 }
  0x93   :  { %v130_v32 = vpop.permute.xlu1 %129 }
  0x94   :  { %v53_v33 = vpop.permute.xlu0 %52 }
  0x95   :  { %v60_v34 = vadd.f32 %v53_v33, %v48_v31 }
  0x97   :  { %483 = vtanh.f32 %v60_v34 }
  0x98   :  { %v162_v36 = vpop.permute.xlu1 %161  ;;  %v71_v46 = vpop.permute.xlu0 %70  ;;  %485 = vtanh.f32 %v61_v62 }
  0x9c   :  { %v92_v17 = vpop.permute.xlu0 %91 }
  0x9d   :  { %v178_v38 = vpop.permute.xlu1 %177 }
  0xa1   :  { %v484_v41 = vpop.eup %483  ;;  %v118_v24 = vpop.permute.xlu0 %117 }
  0xa2   :  { %v81_v42 = vrot.slane %v484_v41, %v639_v39  ;;  %v107_v44 = vrot.slane %v484_v41, %v642_v40  ;;  %v76_v45 = vpop.permute.xlu1 %75  ;;  %v123_v49 = vrot.slane %v484_v41, %v646_v43  ;;  %v139_v53 = vrot.slane %v484_v41, %v651_v50  ;;  %v486_v14 = vpop.eup %485 }
  0xa3   :  { %v155_v61 = vrot.slane %v484_v41, %v154_v52  ;;  %v171_v1 = vrot.slane %v484_v41, %v170_v59  ;;  %v187_v7 = vrot.slane %v484_v41, %v186_v2  ;;  %v203_v12 = vrot.slane %v484_v41, %v202_v8 }
  0xa4   :  { %v82_v47 = vmul.f32 %v81_v42, %v71_v46  ;;  %v108_v48 = vmul.f32 %v107_v44, %v98_v23  ;;  %v124_v56 = vmul.f32 %v123_v49, %v114_v28  ;;  %v140_v60 = vmul.f32 %v139_v53, %v130_v32 }
  0xa5   :  { %v156_v3 = vmul.f32 %v155_v61, %v146_v25  ;;  %v172_v6 = vmul.f32 %v171_v1, %v162_v36  ;;  %v188_v11 = vmul.f32 %v187_v7, %v178_v38  ;;  %v204_v15 = vmul.f32 %v203_v12, %v194_v27 }
  0xa6   :  { %v94_v51 = vadd.f32 %v87_v26, %v82_v47  ;;  %v219_v19 = vrot.slane %v486_v14, %v639_v39  ;;  %v235_v23 = vrot.slane %v486_v14, %v642_v40  ;;  %v83_v25 = vmul.f32 %v81_v42, %v76_v45  ;;  %v258_v33 = vpop.permute.xlu0 %257 }
  0xa7   :  { %v210_v54 = vpop.permute.xlu1 %209  ;;  %v251_v28 = vrot.slane %v486_v14, %v646_v43  ;;  %v125_v34 = vmul.f32 %v123_v49, %v118_v24  ;;  %v267_v35 = vrot.slane %v486_v14, %v651_v50 }
  0xa8   :  { %v110_v55 = vadd.f32 %v108_v48, %v94_v51  ;;  %v220_v20 = vmul.f32 %v219_v19, %v210_v54  ;;  %v95_v27 = vadd.f32 %v92_v17, %v83_v25 }
  0xa9   :  { %v268_v46 = vmul.f32 %v267_v35, %v258_v33 }
  0xaa   :  { %v126_v58 = vadd.f32 %v124_v56, %v110_v55 }
  0xab   :  { %v182_v57 = vpop.permute.xlu0 %181 }
  0xac   :  { %v102_v63 = vpop.permute.xlu1 %101  ;;  %v142_v0 = vadd.f32 %v140_v60, %v126_v58  ;;  %v189_v60 = vmul.f32 %v187_v7, %v182_v57 }
  0xad   :  { %v109_v29 = vmul.f32 %v107_v44, %v102_v63 }
  0xae   :  { %v158_v4 = vadd.f32 %v156_v3, %v142_v0 }
  0xaf   :  { %v111_v36 = vadd.f32 %v109_v29, %v95_v27 }
  0xb0   :  { %v174_v9 = vadd.f32 %v172_v6, %v158_v4 }
  0xb1   :  { %v226_v5 = vpop.permute.xlu1 %225  ;;  %v127_v51 = vadd.f32 %v125_v34, %v111_v36 }
  0xb2   :  { %v190_v13 = vadd.f32 %v188_v11, %v174_v9  ;;  %v236_v26 = vmul.f32 %v235_v23, %v226_v5  ;;  %v230_v5 = vpop.permute.xlu0 %229 }
  0xb3   :  { %v237_v9 = vmul.f32 %v235_v23, %v230_v5 }
  0xb4   :  { %v206_v18 = vadd.f32 %v204_v15, %v190_v13 }
  0xb6   :  { %v242_v10 = vpop.permute.xlu1 %241  ;;  %v222_v22 = vadd.f32 %v220_v20, %v206_v18 }
  0xb7   :  { %v252_v31 = vmul.f32 %v251_v28, %v242_v10 }
  0xb8   :  { %v238_v30 = vadd.f32 %v236_v26, %v222_v22 }
  0xba   :  { %v254_v38 = vadd.f32 %v252_v31, %v238_v30 }
  0xbb   :  { %v134_v16 = vpop.permute.xlu1 %133 }
  0xbc   :  { %v141_v47 = vmul.f32 %v139_v53, %v134_v16  ;;  %v270_v48 = vadd.f32 %v268_v46, %v254_v38 }
  0xbe   :  { %v143_v45 = vadd.f32 %v141_v47, %v127_v51  ;;  %487 = vtanh.f32 %v270_v48 }
  0xc0   :  { %v150_v21 = vpop.permute.xlu1 %149 }
  0xc1   :  { %v157_v42 = vmul.f32 %v155_v61, %v150_v21 }
  0xc3   :  { %v159_v44 = vadd.f32 %v157_v42, %v143_v45 }
  0xc5   :  { %v166_v32 = vpop.permute.xlu1 %165 }
  0xc6   :  { %v173_v54 = vmul.f32 %v171_v1, %v166_v32  ;;  %v279_v1 = vpop.permute.xlu0 %278 }
  0xc8   :  { %v175_v56 = vadd.f32 %v173_v54, %v159_v44  ;;  %v488_v3 = vpop.eup %487 }
  0xc9   :  { %v284_v6 = vrot.slane %v488_v3, %v639_v39  ;;  %v299_v14 = vrot.slane %v488_v3, %v642_v40  ;;  %v319_v23 = vrot.slane %v488_v3, %v651_v50  ;;  %v339_v30 = vrot.slane %v488_v3, %v170_v59 }
  0xca   :  { %v198_v41 = vpop.permute.xlu1 %197  ;;  %v191_v49 = vadd.f32 %v189_v60, %v175_v56  ;;  %v304_v20 = vpop.permute.xlu0 %303  ;;  %v349_v36 = vrot.slane %v488_v3, %v186_v2  ;;  %v359_v47 = vrot.slane %v488_v3, %v202_v8 }
  0xcb   :  { %v205_v62 = vmul.f32 %v203_v12, %v198_v41  ;;  %v285_v13 = vmul.f32 %v284_v6, %v279_v1  ;;  %v309_v12 = vrot.slane %v488_v3, %v646_v43 }
  0xcd   :  { %v207_v4 = vadd.f32 %v205_v62, %v191_v49  ;;  %v310_v22 = vmul.f32 %v309_v12, %v304_v20 }
  0xce   :  { %v334_v27 = vpop.permute.xlu0 %333 }
  0xcf   :  { %v214_v55 = vpop.permute.xlu1 %213  ;;  %v340_v34 = vmul.f32 %v339_v30, %v334_v27 }
  0xd0   :  { %v221_v63 = vmul.f32 %v219_v19, %v214_v55 }
  0xd2   :  { %v223_v53 = vadd.f32 %v221_v63, %v207_v4  ;;  %v364_v45 = vpop.permute.xlu0 %363 }
  0xd4   :  { %v246_v58 = vpop.permute.xlu1 %245  ;;  %v239_v10 = vadd.f32 %v237_v9, %v223_v53 }
  0xd5   :  { %v253_v11 = vmul.f32 %v251_v28, %v246_v58  ;;  %v329_v28 = vrot.slane %v488_v3, %v154_v52 }
  0xd6   :  { %v394_v60 = vpop.permute.xlu0 %393 }
  0xd7   :  { %v255_v18 = vadd.f32 %v253_v11, %v239_v10 }
  0xd9   :  { %v262_v0 = vpop.permute.xlu1 %261 }
  0xda   :  { %v269_v15 = vmul.f32 %v267_v35, %v262_v0 }
  0xdc   :  { %v271_v21 = vadd.f32 %v269_v15, %v255_v18 }
  0xde   :  { %v289_v61 = vpop.permute.xlu1 %288  ;;  %489 = vtanh.f32 %v271_v21 }
  0xdf   :  { %v291_v16 = vadd.f32 %v289_v61, %v285_v13 }
  0xe3   :  { %v294_v7 = vpop.permute.xlu1 %293 }
  0xe4   :  { %v300_v17 = vmul.f32 %v299_v14, %v294_v7 }
  0xe6   :  { %v301_v19 = vadd.f32 %v300_v17, %v291_v16 }
  0xe8   :  { %v314_v24 = vpop.permute.xlu1 %313  ;;  %v311_v25 = vadd.f32 %v310_v22, %v301_v19  ;;  %v490_v46 = vpop.eup %489 }
  0xe9   :  { %v320_v26 = vmul.f32 %v319_v23, %v314_v24  ;;  %v369_v48 = vrot.slane %v490_v46, %v639_v39  ;;  %v379_v44 = vrot.slane %v490_v46, %v642_v40  ;;  %v399_v2 = vrot.slane %v490_v46, %v651_v50 }
  0xea   :  { %v389_v58 = vrot.slane %v490_v46, %v646_v43 }
  0xeb   :  { %v321_v31 = vadd.f32 %v320_v26, %v311_v25  ;;  %v370_v54 = vmul.f32 %v369_v48, %v364_v45  ;;  %v400_v63 = vmul.f32 %v399_v2, %v394_v60 }
  0xed   :  { %v324_v29 = vpop.permute.xlu1 %323 }
  0xee   :  { %v330_v32 = vmul.f32 %v329_v28, %v324_v29 }
  0xf0   :  { %v331_v33 = vadd.f32 %v330_v32, %v321_v31 }
  0xf2   :  { %v344_v35 = vpop.permute.xlu1 %343  ;;  %v341_v38 = vadd.f32 %v340_v34, %v331_v33 }
  0xf3   :  { %v350_v41 = vmul.f32 %v349_v36, %v344_v35 }
  0xf5   :  { %v351_v51 = vadd.f32 %v350_v41, %v341_v38 }
  0xf7   :  { %v354_v52 = vpop.permute.xlu1 %353 }
  0xf8   :  { %v360_v59 = vmul.f32 %v359_v47, %v354_v52 }
  0xfa   :  { %v361_v42 = vadd.f32 %v360_v59, %v351_v51 }
  0xfc   :  { %v374_v55 = vpop.permute.xlu1 %373  ;;  %v371_v56 = vadd.f32 %v370_v54, %v361_v42 }
  0xfd   :  { %v380_v57 = vmul.f32 %v379_v44, %v374_v55 }
  0xff   :  { %v381_v8 = vadd.f32 %v380_v57, %v371_v56 }
 0x101   :  { %v384_v49 = vpop.permute.xlu1 %383 }
 0x102   :  { %v390_v62 = vmul.f32 %v389_v58, %v384_v49 }
 0x104   :  { %v391_v39 = vadd.f32 %v390_v62, %v381_v8 }
 0x106   :  { %v401_v0 = vadd.f32 %v400_v63, %v391_v39 }
 0x108   :  { %v402_v3 = vmin.f32 %v401_v0, 0.0  ;;  %vm409_vm0 = vcmp.gt.f32.partialorder %v401_v0, 0.0 }
 0x10a   :  { %v405_v4 = vmul.f32 1.442695, %v402_v3  ;;  %v403_v5 = vmul.f32 0.5, %v402_v3 }
 0x10c   :  { %491 = vpow2.f32 %v405_v4 }
 0x10d   :  { %493 = vtanh.f32 %v403_v5 }
 0x116   :  { %v492_v53 = vpop.eup %491 }
 0x117   :  { %v407_v40 = vadd.f32 1.0, %v492_v53  ;;  %v494_v6 = vpop.eup %493 }
 0x119   :  { %v408_v61 = vmul.f32 %v494_v6, %v407_v40 }
 0x11b   :  { %v410_v43 = vsel %vm409_vm0, %v401_v0, %v408_v61 }
 0x11c   :  { %v411_v50 = vadd.f32 1.000001, %v410_v43 }
 0x11e   :  { %v415_v9 = vsel %vm414_vm1, %v401_v0, %v411_v50 }
 0x11f   :  { %416 = vst [vmem:[#allocation2] sm:$0x3] %v415_v9 }
 0x120   :  { %506 = shalt.err (!%p503_p4)
}
 0x121   :  { %s507_s21 = scalar_lea.hbm %s706_s7, 32 }
 0x122   :  { %p508_p5 = scmp.ne.s32.totalorder %s706_s7, %s507_s21  ;;  %p511_p6 = scmp.lt.u32.totalorder %s507_s21, %s706_s7 }
 0x124   :  { %p513_p7 = pnand %p511_p6, %p508_p5 }
 0x126   :  { %516 = shalt.err (!%p513_p7)
}
 0x127   :  { %426 = dma.vmem_to_hbm [thread:$0]  %s424_s17, 32, %s706_s7, [#allocation3]  }
 0x128   :  { %517 = dma.done.wait [#allocation3], 32  }
 0x129   :  { %518 = vsyncadd [#allocation3], 4294967264 }
 0x12a   :  { %430 = vsyncpa [#allocation3], 1 }

</bundles_post_ra>
